<compile_context>
chip_gen: v7x
topology: tpu7x:2x2x1
jax: 0.10.0
libtpu: 0.0.40
codegen_flags: <defaults>
</compile_context>

<pallas_src>
import jax
import jax.numpy as jnp
from jax import lax
from jax.experimental import pallas as pl
from jax.experimental.pallas import tpu as pltpu


def _round_up(x, m):
    return ((x + m - 1) // m) * m


def _vmem_budget_bytes():
    """~80% of physical VMEM; conservative (v7x-safe) fallback if unknown."""
    try:
        phys = int(pltpu.get_tpu_info().vmem_capacity_bytes)
    except Exception:
        phys = 64 * 1024 * 1024  # v7x per-TensorCore; safe lower bound
    return max(int(phys * 0.8), 32 * 1024 * 1024)


# ---------------------------------------------------------------------------
# Kernels
# ---------------------------------------------------------------------------

def _kernel_resident_w(x_ref, w_ref, o_ref):
    """Fast path: whole W resident in VMEM.

    x_ref : (tm, Hp)  row tile of x (also supplies the residual)
    w_ref : (Hp, Hp)  full weight, single-buffered, fetched once
    o_ref : (tm, Hp)  output tile, written in one shot (no f32 scratch)
    """
    acc = lax.dot_general(
        x_ref[...], w_ref[...],
        dimension_numbers=(((1,), (1,)), ((), ())),   # contract W's last dim == x @ W.T
        preferred_element_type=jnp.float32,
    )
    o_ref[...] = (acc + x_ref[...].astype(jnp.float32)).astype(o_ref.dtype)


def _kernel_streamed_w(xf_ref, w_ref, xr_ref, o_ref):
    """Fallback: W too large for VMEM -> stream W over output-column stripes.

    xf_ref : (tm, Hp)  full row tile of x (fetched once per row tile)
    w_ref  : (tn, Hp)  stripe of W rows for this output-column block
    xr_ref : (tm, tn)  residual chunk of x for this output-column block
    o_ref  : (tm, tn)  output tile, written in one shot (no f32 scratch)
    """
    acc = lax.dot_general(
        xf_ref[...], w_ref[...],
        dimension_numbers=(((1,), (1,)), ((), ())),
        preferred_element_type=jnp.float32,
    )
    o_ref[...] = (acc + xr_ref[...].astype(jnp.float32)).astype(o_ref.dtype)


# ---------------------------------------------------------------------------
# Wrapper
# ---------------------------------------------------------------------------

def embedding_calibrator(x, weight, *, tm=None, tn=None):
    """x: [..., H], weight: [H, H].  Returns x + x @ weight.T (dtype of x)."""
    orig_shape = x.shape
    H = orig_shape[-1]
    x2d = x.reshape(-1, H)
    M = x2d.shape[0]
    dt = x2d.dtype
    if weight.dtype != dt:
        weight = weight.astype(dt)
    esz = jnp.dtype(dt).itemsize
    wsz = jnp.dtype(weight.dtype).itemsize

    # Pad ONLY the hidden (lane / contraction) dim to a multiple of 128.
    # Zero padding is inert for both matmul and residual; padded output
    # columns are sliced off.  The M axis is NOT padded: the grid uses cdiv
    # and the partial edge block's store is masked by Pallas.
    Hp = _round_up(H, 128)
    if Hp != H:
        x2d = jnp.pad(x2d, ((0, 0), (0, Hp - H)))
        weight = jnp.pad(weight, ((0, Hp - H), (0, Hp - H)))

    budget = _vmem_budget_bytes()
    headroom = 4 * 1024 * 1024            # Mosaic internal scratch, etc.
    w_bytes = Hp * Hp * wsz

    m_cap = 512 if tm is None else max(16, _round_up(tm, 16))

    # W stays fully resident (single buffer) whenever it + minimal tiles fit.
    min_tiles = 2 * 2 * 16 * Hp * esz     # double-buffered 16-row x and out
    resident = (tn is None or tn >= Hp) and (w_bytes + min_tiles + headroom <= budget)

    if resident:
        # ------------------ fast path: resident W -------------------------
        per_row = 2 * Hp * esz + 2 * Hp * esz          # x + out, double-buffered
        avail = budget - headroom - w_bytes
        tm_fit = max(16, (avail // per_row) // 16 * 16)
        tm_sel = int(min(m_cap, _round_up(M, 16), tm_fit))
        grid = (pl.cdiv(M, tm_sel),)

        out2d = pl.pallas_call(
            _kernel_resident_w,
            out_shape=jax.ShapeDtypeStruct((M, Hp), dt),
            grid_spec=pltpu.PrefetchScalarGridSpec(
                num_scalar_prefetch=0,
                grid=grid,
                in_specs=[
                    pl.BlockSpec((tm_sel, Hp), lambda i: (i, 0)),            # x
                    pl.BlockSpec((Hp, Hp), lambda i: (0, 0),                 # W (resident)
                                 pipeline_mode=pl.Buffered(1)),
                ],
                out_specs=pl.BlockSpec((tm_sel, Hp), lambda i: (i, 0)),
            ),
            compiler_params=pltpu.CompilerParams(
                # "parallel" lets the M axis be sharded across TensorCores
                # (megacore / v7x dual-TC).
                dimension_semantics=("parallel",),
                vmem_limit_bytes=int(budget),
            ),
        )(x2d, weight)
    else:
        # ------------------ fallback: streamed W --------------------------
        tn_sel = 512 if tn is None else tn
        tn_sel = max(128, min(_round_up(tn_sel, 128), Hp))
        # Shrink the W stripe until (double-buffered) it leaves room for tiles.
        while tn_sel > 128 and (2 * tn_sel * Hp * wsz + min_tiles + headroom > budget):
            tn_sel -= 128
        w_stripe = 2 * tn_sel * Hp * wsz
        per_row = 2 * Hp * esz + 4 * tn_sel * esz       # xf + xr + out (dbl-buffered)
        avail = budget - headroom - w_stripe
        tm_fit = max(16, (avail // per_row) // 16 * 16)
        tm_sel = int(min(m_cap, _round_up(M, 16), tm_fit))
        grid = (pl.cdiv(M, tm_sel), pl.cdiv(Hp, tn_sel))

        out2d = pl.pallas_call(
            _kernel_streamed_w,
            out_shape=jax.ShapeDtypeStruct((M, Hp), dt),
            grid_spec=pltpu.PrefetchScalarGridSpec(
                num_scalar_prefetch=0,
                grid=grid,
                in_specs=[
                    pl.BlockSpec((tm_sel, Hp), lambda i, j: (i, 0)),      # x (full row)
                    pl.BlockSpec((tn_sel, Hp), lambda i, j: (j, 0)),      # W stripe
                    pl.BlockSpec((tm_sel, tn_sel), lambda i, j: (i, j)),  # x residual
                ],
                out_specs=pl.BlockSpec((tm_sel, tn_sel), lambda i, j: (i, j)),
            ),
            compiler_params=pltpu.CompilerParams(
                dimension_semantics=("parallel", "arbitrary"),
                vmem_limit_bytes=int(budget),
            ),
        )(x2d, weight, x2d)

    if Hp != H:
        out2d = out2d[:, :H]
    return out2d.reshape(orig_shape)


# ---------------------------------------------------------------------------
# Self-test
# ---------------------------------------------------------------------------

if __name__ == "__main__":
    # Small, deterministic example consistent with the module: bf16, H=256.
    B, S, H = 2, 8, 256
    key = jax.random.PRNGKey(0)
    kx, kw, kx2, kw2 = jax.random.split(key, 4)

    x = jax.random.normal(kx, (B, S, H), dtype=jnp.float32).astype(jnp.bfloat16)
    # nn.Parameter(torch.zeros(H, H)) at init; use a small non-zero init so
    # the matmul path is actually exercised.
    weight = (0.02 * jax.random.normal(kw, (H, H), dtype=jnp.float32)).astype(jnp.bfloat16)

    out = jax.block_until_ready(embedding_calibrator(x, weight))
    ref = (x.astype(jnp.float32)
           + x.astype(jnp.float32) @ weight.astype(jnp.float32).T).astype(jnp.bfloat16)
    assert out.shape == x.shape and out.dtype == x.dtype
    err = jnp.max(jnp.abs(out.astype(jnp.float32) - ref.astype(jnp.float32)))
    assert float(err) < 5e-2, f"max_err={float(err)}"

    # Exercise: ragged M (partial edge block, no M padding), H not a multiple
    # of 128 (padded 200 -> 256), and the streamed-W fallback path (tn=128).
    M2, H2 = 70, 200
    x2 = jax.random.normal(kx2, (M2, H2), jnp.float32).astype(jnp.bfloat16)
    w2 = (0.02 * jax.random.normal(kw2, (H2, H2), jnp.float32)).astype(jnp.bfloat16)
    out2 = jax.block_until_ready(embedding_calibrator(x2, w2, tn=128))
    ref2 = (x2.astype(jnp.float32)
            + x2.astype(jnp.float32) @ w2.astype(jnp.float32).T).astype(jnp.bfloat16)
    err2 = jnp.max(jnp.abs(out2.astype(jnp.float32) - ref2.astype(jnp.float32)))
    assert float(err2) < 5e-2, f"max_err2={float(err2)}"

    print("KERNEL_OK")
</pallas_src>

<mosaic_0001>
module attributes {stable_mosaic.version = 11 : i64} {
  func.func @_kernel_resident_w(%arg0: i32, %arg1: memref<16x256xbf16, #tpu.memory_space<vmem>>, %arg2: memref<256x256xbf16, #tpu.memory_space<vmem>>, %arg3: memref<16x256xbf16, #tpu.memory_space<vmem>>) attributes {dimension_semantics = [#tpu.dimension_semantics<parallel>], iteration_bounds = array<i64: 1>, scalar_prefetch = 0 : i64, scratch_operands = 0 : i64, tpu.core_type = #tpu.core_type<tc>, window_params = [{transform_indices = @transform_0, window_bounds = array<i64: 16, 256>}, {pipeline_mode = #tpu.pipeline_mode<synchronous>, transform_indices = @transform_1, window_bounds = array<i64: 256, 256>}, {transform_indices = @transform_2, window_bounds = array<i64: 16, 256>}]} {
    %c0 = arith.constant 0 : index
    %c0_0 = arith.constant 0 : index
    %0 = vector.load %arg1[%c0, %c0_0] : memref<16x256xbf16, #tpu.memory_space<vmem>>, vector<16x256xbf16>
    %c0_1 = arith.constant 0 : index
    %c0_2 = arith.constant 0 : index
    %1 = vector.load %arg2[%c0_1, %c0_2] : memref<256x256xbf16, #tpu.memory_space<vmem>>, vector<256x256xbf16>
    %cst = arith.constant dense<0.000000e+00> : vector<16x256xf32>
    %2 = tpu.matmul %0, %1, %cst {dimension_numbers = #tpu.dot_dimension_numbers<[1], [1], [0], [0], [0, 0, 1, 0], [], []>} : vector<16x256xbf16>, vector<256x256xbf16>, vector<16x256xf32> -> vector<16x256xf32>
    %c0_3 = arith.constant 0 : index
    %c0_4 = arith.constant 0 : index
    %3 = vector.load %arg1[%c0_3, %c0_4] : memref<16x256xbf16, #tpu.memory_space<vmem>>, vector<16x256xbf16>
    %4 = arith.extf %3 : vector<16x256xbf16> to vector<16x256xf32>
    %5 = arith.addf %2, %4 : vector<16x256xf32>
    %6 = arith.truncf %5 : vector<16x256xf32> to vector<16x256xbf16>
    %c0_5 = arith.constant 0 : index
    %c0_6 = arith.constant 0 : index
    %7 = vector.load %arg3[%c0_5, %c0_6] : memref<16x256xbf16, #tpu.memory_space<vmem>>, vector<16x256xbf16>
    tpu.vector_store %arg3[%c0_5, %c0_6], %6 {strides = array<i32>} : memref<16x256xbf16, #tpu.memory_space<vmem>>, vector<16x256xbf16>,
    return
  }
  func.func @transform_0(%arg0: i32) -> (i32, i32) {
    %c0_i32 = arith.constant 0 : i32
    %c0_i32_0 = arith.constant 0 : i32
    return %arg0, %c0_i32 : i32, i32
  }
  func.func @transform_1(%arg0: i32) -> (i32, i32) {
    %c0_i32 = arith.constant 0 : i32
    %c0_i32_0 = arith.constant 0 : i32
    %c0_i32_1 = arith.constant 0 : i32
    return %c0_i32, %c0_i32_0 : i32, i32
  }
  func.func @transform_2(%arg0: i32) -> (i32, i32) {
    %c0_i32 = arith.constant 0 : i32
    %c0_i32_0 = arith.constant 0 : i32
    return %arg0, %c0_i32 : i32, i32
  }
}

</mosaic_0001>

<bundles_post_ra>
// kernel: tpu_custom_call.1
= control target key start
LH: loop header
LB: loop body
LE: loop exit
PB: predicated region body
PF: predicated region fallthrough
CT: control target
= control target key end

     0   :  { %7 = vsyncpa [#allocation3], 0  ;;  %s565_s0 = inlined_call_operand.hbm [shape: bf16[16,256], index: 0, kind: input, shape index: {}]   ;;  %s566_s1 = inlined_call_operand.hbm [shape: bf16[256,256], index: 1, kind: input, shape index: {}]   ;;  %s567_s2 = inlined_call_operand.hbm [shape: bf16[16,256], index: 2, kind: output, shape index: {}]  }
   0x1   :  { %8 = vsyncpa [#allocation6], 0 }
   0x2   :  { %9 = vsyncpa [#allocation4], 0  ;;  %s488_s9 = smov [#allocation2]   ;;  %s416_s13 = scalar_lea.hbm %s565_s0, 256 }
   0x3   :  { %s15_s10 = sshll.u32 %s488_s9, 4  ;;  %p417_p0 = scmp.ne.s32.totalorder %s565_s0, %s416_s13  ;;  %s16_s10 = int_to_ptr.vmem [resolvable:$true] %s15_s10 }
   0x4   :  { %p420_p1 = scmp.lt.u32.totalorder %s416_s13, %s565_s0 }
   0x6   :  { %p422_p2 = pnand %p420_p1, %p417_p0 }
   0x8   :  { %425 = shalt.err (!%p422_p2)
}
   0x9   :  { %s426_s18 = scalar_lea.vmem %s16_s10, 256  ;;  %p431_p4 = scmp.lt.s32.totalorder %s16_s10, %s16_s10 }
   0xa   :  { %p427_p3 = scmp.ne.s32.totalorder %s16_s10, %s426_s18  ;;  %p432_p5 = scmp.lt.s32.totalorder %s426_s18, %s426_s18 }
   0xc   :  { %p433_p6 = por %p432_p5, %p431_p4 }
   0xe   :  { %p434_p7 = pnand %p433_p6, %p427_p3 }
  0x10   :  { %437 = shalt.err (!%p434_p7)
}
  0x11   :  { %s489_s19 = smov 128   ;;  %s490_s20 = smov 8  }
  0x12   :  { %21 = dma.hbm_to_vmem [thread:$0]  %s565_s0, 256, %s16_s10, [#allocation3], %s489_s19, %s489_s19, %s490_s20  }
  0x13   :  { %s491_s23 = smov [#allocation5]   ;;  %s438_s27 = scalar_lea.hbm %s566_s1, 4096 }
  0x14   :  { %s27_s24 = sshll.u32 %s491_s23, 4  ;;  %p439_p8 = scmp.ne.s32.totalorder %s566_s1, %s438_s27  ;;  %s28_s24 = int_to_ptr.vmem [resolvable:$true] %s27_s24 }
  0x15   :  { %p442_p9 = scmp.lt.u32.totalorder %s438_s27, %s566_s1 }
  0x17   :  { %p444_p10 = pnand %p442_p9, %p439_p8 }
  0x19   :  { %447 = shalt.err (!%p444_p10)
}
  0x1a   :  { %s448_s4 = scalar_lea.vmem %s28_s24, 4096  ;;  %p453_p12 = scmp.lt.s32.totalorder %s28_s24, %s28_s24 }
  0x1b   :  { %p449_p11 = scmp.ne.s32.totalorder %s28_s24, %s448_s4  ;;  %p454_p13 = scmp.lt.s32.totalorder %s448_s4, %s448_s4 }
  0x1d   :  { %p455_p0 = por %p454_p13, %p453_p12 }
  0x1f   :  { %p456_p1 = pnand %p455_p0, %p449_p11 }
  0x21   :  { %459 = shalt.err (!%p456_p1)
}
  0x22   :  { %33 = dma.hbm_to_vmem [thread:$0]  %s566_s1, 4096, %s28_s24, [#allocation6], %s489_s19, %s489_s19, %s490_s20  }
  0x23   :  { %482 = dma.done.wait [#allocation3], 256  }
  0x24   :  { %483 = vsyncadd [#allocation3], 4294967040 }
  0x25   :  { %484 = dma.done.wait [#allocation6], 4096  }
  0x26   :  { %485 = vsyncadd [#allocation6], 4294963200  ;;  %v366_v0 = vld [vmem:[#allocation5 + $0x4] ss:$8 sps:$4 sm:$0xff]   ;;  %v368_v1 = vld [vmem:[#allocation5] ss:$8 sps:$4 sm:$0xff]  }
  0x27   :  { %248 = vmatprep.subr.bf16.mxu0 %v366_v0  ;;  %v369_v2 = vld [vmem:[#allocation5 + $0x14] ss:$8 sps:$4 sm:$0xff]   ;;  %v371_v3 = vld [vmem:[#allocation5 + $0x10] ss:$8 sps:$4 sm:$0xff]   ;;  %v372_v4 = vld [vmem:[#allocation5 + $0x24] ss:$8 sps:$4 sm:$0xff]  }
  0x28   :  { %249 = vmatpush1.bf16.xpose.msra.mxu0 %v368_v1  ;;  %v374_v5 = vld [vmem:[#allocation5 + $0x20] ss:$8 sps:$4 sm:$0xff]   ;;  %v375_v6 = vld [vmem:[#allocation5 + $0x34] ss:$8 sps:$4 sm:$0xff]   ;;  %v377_v10 = vld [vmem:[#allocation5 + $0x30] ss:$8 sps:$4 sm:$0xff]  }
  0x29   :  { %250 = vmatprep.subr.bf16.mxu0 %v369_v2  ;;  %v538_v7 = vld [vmem:[#allocation2] sm:$0xff]  ;;  %v540_v8 = vld [vmem:[#allocation2 + $0x8] sm:$0xff]  ;;  %v378_v11 = vld [vmem:[#allocation5 + $0x44] ss:$8 sps:$4 sm:$0xff]   ;;  %s492_s1 = smov [#allocation7]  }
  0x2a   :  { %v324_v9 = vcombine.high %v538_v7, %v540_v8  ;;  %v380_v12 = vld [vmem:[#allocation5 + $0x40] ss:$8 sps:$4 sm:$0xff]   ;;  %v381_v13 = vld [vmem:[#allocation5 + $0x54] ss:$8 sps:$4 sm:$0xff]   ;;  %v383_v14 = vld [vmem:[#allocation5 + $0x50] ss:$8 sps:$4 sm:$0xff]   ;;  %v323_v35 = vcombine.low %v538_v7, %v540_v8  ;;  %v74_v36 = vunpack.c.l.bf16 %v538_v7  ;;  %v75_v37 = vunpack.c.h.bf16 %v538_v7 }
  0x2b   :  { %v384_v15 = vld [vmem:[#allocation5 + $0x64] ss:$8 sps:$4 sm:$0xff]   ;;  %v386_v16 = vld [vmem:[#allocation5 + $0x60] ss:$8 sps:$4 sm:$0xff]   ;;  %v387_v17 = vld [vmem:[#allocation5 + $0x74] ss:$8 sps:$4 sm:$0xff]   ;;  %v76_v38 = vunpack.c.l.bf16 %v540_v8  ;;  %v77_v40 = vunpack.c.h.bf16 %v540_v8 }
  0x2c   :  { %280 = vmatprep.mubr.bf16.mxu0 %v324_v9  ;;  %v389_v18 = vld [vmem:[#allocation5 + $0x70] ss:$8 sps:$4 sm:$0xff]   ;;  %v390_v19 = vld [vmem:[#allocation5 + $0x84] ss:$8 sps:$4 sm:$0xff]   ;;  %v392_v20 = vld [vmem:[#allocation5 + $0x80] ss:$8 sps:$4 sm:$0xff]  }
  0x2d   :  { %v393_v21 = vld [vmem:[#allocation5 + $0x94] ss:$8 sps:$4 sm:$0xff]   ;;  %v395_v22 = vld [vmem:[#allocation5 + $0x90] ss:$8 sps:$4 sm:$0xff]   ;;  %v396_v23 = vld [vmem:[#allocation5 + $0xa4] ss:$8 sps:$4 sm:$0xff]  }
  0x2e   :  { %v398_v24 = vld [vmem:[#allocation5 + $0xa0] ss:$8 sps:$4 sm:$0xff]   ;;  %v399_v25 = vld [vmem:[#allocation5 + $0xb4] ss:$8 sps:$4 sm:$0xff]   ;;  %v401_v26 = vld [vmem:[#allocation5 + $0xb0] ss:$8 sps:$4 sm:$0xff]  }
  0x2f   :  { %v402_v27 = vld [vmem:[#allocation5 + $0xc4] ss:$8 sps:$4 sm:$0xff]   ;;  %v404_v28 = vld [vmem:[#allocation5 + $0xc0] ss:$8 sps:$4 sm:$0xff]   ;;  %v405_v29 = vld [vmem:[#allocation5 + $0xd4] ss:$8 sps:$4 sm:$0xff]  }
  0x30   :  { %251 = vmatpush1.bf16.xpose.msra.mxu0 %v371_v3  ;;  %v407_v30 = vld [vmem:[#allocation5 + $0xd0] ss:$8 sps:$4 sm:$0xff]   ;;  %v408_v31 = vld [vmem:[#allocation5 + $0xe4] ss:$8 sps:$4 sm:$0xff]   ;;  %v410_v32 = vld [vmem:[#allocation5 + $0xe0] ss:$8 sps:$4 sm:$0xff]  }
  0x31   :  { %252 = vmatprep.subr.bf16.mxu0 %v372_v4  ;;  %v411_v33 = vld [vmem:[#allocation5 + $0xf4] ss:$8 sps:$4 sm:$0xff]   ;;  %v413_v34 = vld [vmem:[#allocation5 + $0xf0] ss:$8 sps:$4 sm:$0xff]   ;;  %s310_s6 = sshll.u32 %s492_s1, 4  ;;  %s311_s6 = int_to_ptr.vmem [resolvable:$true] %s310_s6 }
  0x32   :  { %s460_s7 = scalar_lea.vmem %s311_s6, 256  ;;  %p465_p3 = scmp.lt.s32.totalorder %s311_s6, %s311_s6 }
  0x33   :  { %p461_p2 = scmp.ne.s32.totalorder %s311_s6, %s460_s7  ;;  %p466_p4 = scmp.lt.s32.totalorder %s460_s7, %s460_s7 }
  0x35   :  { %p467_p5 = por %p466_p4, %p465_p3 }
  0x37   :  { %p468_p6 = pnand %p467_p5, %p461_p2 }
  0x38   :  { %253 = vmatpush1.bf16.xpose.msra.mxu0 %v374_v5 }
  0x39   :  { %254 = vmatprep.subr.bf16.mxu0 %v375_v6 }
  0x40   :  { %255 = vmatpush1.bf16.xpose.msra.mxu0 %v377_v10 }
  0x41   :  { %256 = vmatprep.subr.bf16.mxu0 %v378_v11 }
  0x48   :  { %257 = vmatpush1.bf16.xpose.msra.mxu0 %v380_v12 }
  0x49   :  { %258 = vmatprep.subr.bf16.mxu0 %v381_v13 }
  0x50   :  { %259 = vmatpush1.bf16.xpose.msra.mxu0 %v383_v14 }
  0x51   :  { %260 = vmatprep.subr.bf16.mxu0 %v384_v15 }
  0x58   :  { %261 = vmatpush1.bf16.xpose.msra.mxu0 %v386_v16 }
  0x59   :  { %262 = vmatprep.subr.bf16.mxu0 %v387_v17 }
  0x60   :  { %263 = vmatpush1.bf16.xpose.msra.mxu0 %v389_v18 }
  0x61   :  { %264 = vmatprep.subr.bf16.mxu0 %v390_v19 }
  0x68   :  { %265 = vmatpush1.bf16.xpose.msra.mxu0 %v392_v20 }
  0x69   :  { %266 = vmatprep.subr.bf16.mxu0 %v393_v21 }
  0x70   :  { %267 = vmatpush1.bf16.xpose.msra.mxu0 %v395_v22 }
  0x71   :  { %268 = vmatprep.subr.bf16.mxu0 %v396_v23 }
  0x78   :  { %269 = vmatpush1.bf16.xpose.msra.mxu0 %v398_v24 }
  0x79   :  { %270 = vmatprep.subr.bf16.mxu0 %v399_v25 }
  0x80   :  { %271 = vmatpush1.bf16.xpose.msra.mxu0 %v401_v26 }
  0x81   :  { %272 = vmatprep.subr.bf16.mxu0 %v402_v27 }
  0x88   :  { %273 = vmatpush1.bf16.xpose.msra.mxu0 %v404_v28 }
  0x89   :  { %274 = vmatprep.subr.bf16.mxu0 %v405_v29 }
  0x90   :  { %275 = vmatpush1.bf16.xpose.msra.mxu0 %v407_v30 }
  0x91   :  { %276 = vmatprep.subr.bf16.mxu0 %v408_v31 }
  0x98   :  { %277 = vmatpush1.bf16.xpose.msra.mxu0 %v410_v32 }
  0x99   :  { %278 = vmatprep.subr.bf16.mxu0 %v411_v33 }
  0xa0   :  { %279 = vmatpush1.bf16.xpose.msra.mxu0 %v413_v34 }
  0xa7   :  { %281 = vmatmul.mubr.bf16.vlgmr.msra.gmra.mrb[0].mxu0 %v323_v35 }
 0x17a   :  { %v282_v39 = vpop.f32.mrb[0].mxu0 }
 0x17b   :  { %v283_v41 = vadd.f32 %v282_v39, %v74_v36  ;;  %v284_v42 = vpop.f32.mrb[1].mxu0 }
 0x17c   :  { %v285_v43 = vadd.f32 %v284_v42, %v75_v37  ;;  %v286_v44 = vpop.f32.mrb[2].mxu0 }
 0x17d   :  { %v287_v45 = vadd.f32 %v286_v44, %v76_v38  ;;  %v288_v46 = vpop.f32.mrb[3].mxu0 }
 0x17e   :  { %v359_v47 = vpack.c.bf16 %v285_v43, %v283_v41  ;;  %v289_v48 = vadd.f32 %v288_v46, %v77_v40 }
 0x180   :  { %303 = vst [vmem:[#allocation7] sm:$0xff] %v359_v47  ;;  %v360_v49 = vpack.c.bf16 %v289_v48, %v287_v45 }
 0x182   :  { %304 = vst [vmem:[#allocation7 + $0x8] sm:$0xff] %v360_v49 }
 0x183   :  { %471 = shalt.err (!%p468_p6)
}
 0x184   :  { %s472_s10 = scalar_lea.hbm %s567_s2, 256 }
 0x185   :  { %p473_p7 = scmp.ne.s32.totalorder %s567_s2, %s472_s10  ;;  %p476_p8 = scmp.lt.u32.totalorder %s472_s10, %s567_s2 }
 0x187   :  { %p478_p9 = pnand %p476_p8, %p473_p7 }
 0x189   :  { %481 = shalt.err (!%p478_p9)
}
 0x18a   :  { %316 = dma.vmem_to_hbm [thread:$0]  %s311_s6, 256, %s567_s2, [#allocation4], %s489_s19, %s489_s19, %s490_s20  }
 0x18b   :  { %486 = dma.done.wait [#allocation4], 256  }
 0x18c   :  { %487 = vsyncadd [#allocation4], 4294967040 }
 0x18d   :  { %320 = vsyncpa [#allocation3], 1 }
 0x18e   :  { %321 = vsyncpa [#allocation6], 1 }
 0x18f   :  { %322 = vsyncpa [#allocation4], 1 }

</bundles_post_ra>
